<compile_context>
chip_gen: v7x
topology: tpu7x:2x2x1
jax: 0.10.0
libtpu: 0.0.40
codegen_flags: <defaults>
</compile_context>

<pallas_src>
import jax
import jax.numpy as jnp
from jax.experimental import pallas as pl
from jax.experimental.pallas import tpu as pltpu


def _scale_mul_kernel(scale_ref, gf_ref, out_ref):
    # (TR, 1) * (TR, TL): per-row broadcast = pure VPU lane splat.  Mixed-dtype
    # inputs (e.g. bf16 features, f32 scale) promote to f32, matching PyTorch.
    out_ref[...] = (gf_ref[...] * scale_ref[...]).astype(out_ref.dtype)


def _pick_tiles(R, L, itemsize, target_bytes):
    """Choose (row_tile, col_tile) for the flattened (R, L) feature map."""
    align_r = max(8, 32 // itemsize)   # sublane packing: 8 f32 / 16 bf16 / 32 i8

    # Column tile: full extent when modest; otherwise a 128-aligned cap so the
    # per-step block stays near `target_bytes` even when L % 128 != 0 (a
    # partial last column block is legal since the block shape is 128-divisible).
    TL = L if L <= 4096 else 4096

    # Row tile: as many rows as fit in the per-block byte budget.
    max_rows = max(1, target_bytes // (TL * itemsize))
    if R <= max_rows:
        TR = R                          # full extent -> always a legal block
    else:
        TR = min(R, max(align_r, (max_rows // align_r) * align_r))

    # Keep >= 2 blocks for multi-MiB tensors that would otherwise be a single
    # grid step, so both v7x TensorCores get work.
    if TR == R and TL == L and R >= 2 * align_r and R * L * itemsize > (2 << 20):
        half = (R + 1) // 2
        TR = ((half + align_r - 1) // align_r) * align_r
    return TR, TL


def channel_atten(global_features, instance_params, weight, bias,
                  target_block_bytes=4 << 20):
    """global_features: (B, C, H, W); instance_params: (B, in_ch);
       weight: (C, in_ch) (PyTorch nn.Linear layout); bias: (C,)."""
    B, C, H, W = global_features.shape

    # ---- Step 1: tiny Linear in the wrapper (XLA fuses it; no pallas_call) ----
    scale = instance_params @ weight.T + bias           # (B, C), promoted dtype
    out_dtype = jnp.result_type(global_features.dtype, scale.dtype)

    # ---- Step 2: lane-dense flattening of the feature map ----
    L0 = H * W
    if L0 % 128 == 0 or W % 128 != 0:
        R, L, rep = B * C, L0, 1        # (B*C, H*W); also the fallback case
    else:
        R, L, rep = B * C * H, W, H     # (B*C*H, W): lane-dense when W % 128 == 0

    gf_flat = global_features.reshape(R, L)              # free row-major reshape
    scale_col = scale.reshape(B * C, 1)
    if rep > 1:
        scale_col = jnp.repeat(scale_col, rep, axis=0)   # (R, 1): tiny glue

    in_itemsize = jnp.dtype(global_features.dtype).itemsize
    out_itemsize = jnp.dtype(out_dtype).itemsize
    sc_itemsize = jnp.dtype(scale_col.dtype).itemsize

    TR, TL = _pick_tiles(R, L, in_itemsize, target_block_bytes)
    grid = (pl.cdiv(R, TR), pl.cdiv(L, TL))

    # Double-buffered in + out tiles + (lane-padded) scale column + slack.
    needed = 2 * (TR * TL * (in_itemsize + out_itemsize)
                  + TR * 128 * sc_itemsize) + (1 << 20)
    # >= what v5e's 16 MiB scoped default would reject; < v7x's 64 MiB physical.
    vmem_limit = int(min(max(needed, 32 << 20), 56 << 20))

    out_flat = pl.pallas_call(
        _scale_mul_kernel,
        out_shape=jax.ShapeDtypeStruct((R, L), out_dtype),
        grid_spec=pltpu.PrefetchScalarGridSpec(
            num_scalar_prefetch=0,
            grid=grid,
            in_specs=[
                # Per-row scale: block index is constant over the inner c axis,
                # so the pipeline copies it only once per row tile.
                pl.BlockSpec((TR, 1), lambda r, c: (r, 0)),
                pl.BlockSpec((TR, TL), lambda r, c: (r, c)),
            ],
            out_specs=pl.BlockSpec((TR, TL), lambda r, c: (r, c)),
        ),
        compiler_params=pltpu.CompilerParams(
            dimension_semantics=("parallel", "parallel"),
            vmem_limit_bytes=vmem_limit),
        cost_estimate=pl.CostEstimate(
            flops=R * L,
            transcendentals=0,
            bytes_accessed=R * L * (in_itemsize + out_itemsize) + R * sc_itemsize),
    )(scale_col, gf_flat)

    return out_flat.reshape(B, C, H, W)


if __name__ == "__main__":
    # Small shapes consistent with the module: in_channels=8, out_channels=C=4.
    B, C, H, W = 2, 4, 16, 16
    in_ch = 8

    key = jax.random.PRNGKey(0)
    k_gf, k_ip, k_w, k_b = jax.random.split(key, 4)

    global_features = jax.random.normal(k_gf, (B, C, H, W), dtype=jnp.float32)
    instance_params = jax.random.normal(k_ip, (B, in_ch), dtype=jnp.float32)

    # Deterministic Linear(in_ch, C) params, PyTorch-style uniform(-1/sqrt(in), 1/sqrt(in)).
    bound = 1.0 / jnp.sqrt(jnp.array(in_ch, dtype=jnp.float32))
    weight = jax.random.uniform(k_w, (C, in_ch), minval=-bound, maxval=bound,
                                dtype=jnp.float32)
    bias = jax.random.uniform(k_b, (C,), minval=-bound, maxval=bound,
                              dtype=jnp.float32)

    out = channel_atten(global_features, instance_params, weight, bias)
    out = jax.block_until_ready(out)

    # Pure-JAX reference for correctness.
    scale_ref = instance_params @ weight.T + bias              # (B, C)
    ref = global_features * scale_ref.reshape(B, C, 1, 1)

    assert out.shape == (B, C, H, W)
    assert out.dtype == ref.dtype
    assert jnp.allclose(out, ref, atol=1e-5, rtol=1e-5), "mismatch vs reference"

    print("KERNEL_OK")
</pallas_src>

<mosaic_0001>
module attributes {stable_mosaic.version = 11 : i64} {
  func.func @_scale_mul_kernel(%arg0: i32, %arg1: i32, %arg2: memref<8x1xf32, #tpu.memory_space<vmem>>, %arg3: memref<8x256xf32, #tpu.memory_space<vmem>>, %arg4: memref<8x256xf32, #tpu.memory_space<vmem>>) attributes {dimension_semantics = [#tpu.dimension_semantics<parallel>, #tpu.dimension_semantics<parallel>], iteration_bounds = array<i64: 1, 1>, scalar_prefetch = 0 : i64, scratch_operands = 0 : i64, tpu.core_type = #tpu.core_type<tc>, window_params = [{transform_indices = @transform_0, window_bounds = array<i64: 8, 1>}, {transform_indices = @transform_1, window_bounds = array<i64: 8, 256>}, {transform_indices = @transform_2, window_bounds = array<i64: 8, 256>}]} {
    %c0 = arith.constant 0 : index
    %c0_0 = arith.constant 0 : index
    %0 = vector.load %arg3[%c0, %c0_0] : memref<8x256xf32, #tpu.memory_space<vmem>>, vector<8x256xf32>
    %c0_1 = arith.constant 0 : index
    %c0_2 = arith.constant 0 : index
    %1 = vector.load %arg2[%c0_1, %c0_2] : memref<8x1xf32, #tpu.memory_space<vmem>>, vector<8x1xf32>
    %2 = vector.broadcast %1 : vector<8x1xf32> to vector<8x256xf32>
    %3 = arith.mulf %0, %2 : vector<8x256xf32>
    %c0_3 = arith.constant 0 : index
    %c0_4 = arith.constant 0 : index
    %4 = vector.load %arg4[%c0_3, %c0_4] : memref<8x256xf32, #tpu.memory_space<vmem>>, vector<8x256xf32>
    tpu.vector_store %arg4[%c0_3, %c0_4], %3 {strides = array<i32>} : memref<8x256xf32, #tpu.memory_space<vmem>>, vector<8x256xf32>,
    return
  }
  func.func @transform_0(%arg0: i32, %arg1: i32) -> (i32, i32) {
    %c0_i32 = arith.constant 0 : i32
    %c0_i32_0 = arith.constant 0 : i32
    return %arg0, %c0_i32 : i32, i32
  }
  func.func @transform_1(%arg0: i32, %arg1: i32) -> (i32, i32) {
    %c0_i32 = arith.constant 0 : i32
    return %arg0, %arg1 : i32, i32
  }
  func.func @transform_2(%arg0: i32, %arg1: i32) -> (i32, i32) {
    %c0_i32 = arith.constant 0 : i32
    return %arg0, %arg1 : i32, i32
  }
}

</mosaic_0001>

<bundles_post_ra>
// kernel: tpu_custom_call.1
= control target key start
LH: loop header
LB: loop body
LE: loop exit
PB: predicated region body
PF: predicated region fallthrough
CT: control target
= control target key end

     0   :  { %7 = vsyncpa [#allocation3], 0  ;;  %s148_s0 = inlined_call_operand.vmem [shape: f32[8,1], index: 0, kind: input, shape index: {}]   ;;  %s149_s1 = inlined_call_operand.hbm [shape: f32[8,256], index: 1, kind: input, shape index: {}]   ;;  %s150_s2 = inlined_call_operand.hbm [shape: f32[8,256], index: 2, kind: output, shape index: {}]  }
   0x1   :  { %8 = vsyncpa [#allocation4], 0  ;;  %s103_s9 = smov [#allocation2]   ;;  %s55_s13 = scalar_lea.hbm %s149_s1, 256 }
   0x2   :  { %s17_s10 = sshll.u32 %s103_s9, 4  ;;  %p56_p0 = scmp.ne.s32.totalorder %s149_s1, %s55_s13  ;;  %s18_s10 = int_to_ptr.vmem [resolvable:$true] %s17_s10 }
   0x3   :  { %p59_p1 = scmp.lt.u32.totalorder %s55_s13, %s149_s1 }
   0x5   :  { %p61_p2 = pnand %p59_p1, %p56_p0 }
   0x7   :  { %64 = shalt.err (!%p61_p2)
}
   0x8   :  { %s65_s18 = scalar_lea.vmem %s18_s10, 256  ;;  %p70_p4 = scmp.lt.s32.totalorder %s18_s10, %s18_s10 }
   0x9   :  { %p66_p3 = scmp.ne.s32.totalorder %s18_s10, %s65_s18  ;;  %p71_p5 = scmp.lt.s32.totalorder %s65_s18, %s65_s18 }
   0xb   :  { %p72_p6 = por %p71_p5, %p70_p4 }
   0xd   :  { %p73_p7 = pnand %p72_p6, %p66_p3 }
   0xf   :  { %76 = shalt.err (!%p73_p7)
}
  0x10   :  { %20 = dma.hbm_to_vmem [thread:$0]  %s149_s1, 256, %s18_s10, [#allocation3]  }
  0x11   :  { %99 = dma.done.wait [#allocation3], 256  }
  0x12   :  { %100 = vsyncadd [#allocation3], 4294967040  ;;  %v104_v0 = vmov 0   ;;  %v26_v1 = vld [vmem:[%s148_s0] sm:$0xff]  ;;  %v25_v3 = vld [vmem:[#allocation2 + $0x8] sm:$0xff]  ;;  %s105_s23 = smov [#allocation5]  }
  0x13   :  { %54 = vset.pattern.permute.xlu0 %v104_v0  ;;  %v24_v2 = vld [vmem:[#allocation2] sm:$0xff]  ;;  %s42_s24 = sshll.u32 %s105_s23, 4  ;;  %s43_s24 = int_to_ptr.vmem [resolvable:$true] %s42_s24 }
  0x14   :  { %29 = vperm.xlu0 %54, %v26_v1   ;;  %s77_s1 = scalar_lea.vmem %s43_s24, 256  ;;  %p82_p9 = scmp.lt.s32.totalorder %s43_s24, %s43_s24 }
  0x15   :  { %p78_p8 = scmp.ne.s32.totalorder %s43_s24, %s77_s1  ;;  %p83_p10 = scmp.lt.s32.totalorder %s77_s1, %s77_s1 }
  0x17   :  { %p84_p11 = por %p83_p10, %p82_p9 }
  0x19   :  { %p85_p12 = pnand %p84_p11, %p78_p8 }
  0x93   :  { %v30_v4 = vpop.permute.xlu0 %29 }
  0x94   :  { %v32_v5 = vmul.f32 %v30_v4, %v24_v2  ;;  %v33_v6 = vmul.f32 %v30_v4, %v25_v3 }
  0x96   :  { %34 = vst [vmem:[#allocation5] sm:$0xff] %v32_v5  ;;  %35 = vst [vmem:[#allocation5 + $0x8] sm:$0xff] %v33_v6 }
  0x97   :  { %88 = shalt.err (!%p85_p12)
}
  0x98   :  { %s89_s26 = scalar_lea.hbm %s150_s2, 256 }
  0x99   :  { %p90_p13 = scmp.ne.s32.totalorder %s150_s2, %s89_s26  ;;  %p93_p0 = scmp.lt.u32.totalorder %s89_s26, %s150_s2 }
  0x9b   :  { %p95_p1 = pnand %p93_p0, %p90_p13 }
  0x9d   :  { %98 = shalt.err (!%p95_p1)
}
  0x9e   :  { %45 = dma.vmem_to_hbm [thread:$0]  %s43_s24, 256, %s150_s2, [#allocation4]  }
  0x9f   :  { %101 = dma.done.wait [#allocation4], 256  }
  0xa0   :  { %102 = vsyncadd [#allocation4], 4294967040 }
  0xa1   :  { %49 = vsyncpa [#allocation3], 1 }
  0xa2   :  { %50 = vsyncpa [#allocation4], 1 }

</bundles_post_ra>
